<compile_context>
chip_gen: v7x
topology: tpu7x:2x2x1
jax: 0.10.0
libtpu: 0.0.40
codegen_flags: <defaults>
</compile_context>

<pallas_src>
import functools

import jax
import jax.numpy as jnp
from jax.experimental import pallas as pl
from jax.experimental.pallas import tpu as pltpu


HIDDEN = 10
OUT = 8

_DEFAULT_TILE_N = 4096   # lanes per grid step (BlockSpec / DMA granularity)
_DEFAULT_CHUNK = 512     # lanes per inner compute chunk (vreg-resident)


def _round_up(x, m):
    return ((x + m - 1) // m) * m


def _paramnn_kernel(t_ref, w1_ref, b1_ref, w2_ref, b2_ref, w3_ref, b3_ref, o_ref,
                    *, chunk, apply_sigmoid):
    """One (1, tile_n) time tile -> one (OUT, tile_n) lane-major output tile.

    Layout: the batch/time axis is the LANE (last) axis, so the tanh's, bias
    adds and output stores are lane-dense.  The tile is processed in `chunk`
    lane pieces so intermediates stay in vregs even for large tiles.
    """
    tile_n = t_ref.shape[1]
    n_chunks = tile_n // chunk

    # Tiny weights/biases: load once per grid step, reuse across all chunks.
    w1 = w1_ref[...]   # (H, 1)
    b1 = b1_ref[...]   # (H, 1)
    w2 = w2_ref[...]   # (H, H)
    b2 = b2_ref[...]   # (H, 1)
    w3 = w3_ref[...]   # (OUT, H)
    b3 = b3_ref[...]   # (OUT, 1)

    for c in range(n_chunks):                  # static trip count, static slices
        off = c * chunk
        x = t_ref[:, pl.ds(off, chunk)]        # (1, chunk)

        # Layer 1: contraction K=1 -> pure VPU broadcast multiply-add (no MXU).
        h1 = jnp.tanh(w1 * x + b1)             # (H, chunk)

        # Layer 2: MXU (H, H) @ (H, chunk), f32 accumulate.
        h2 = jnp.tanh(
            jnp.dot(w2, h1, preferred_element_type=jnp.float32) + b2
        )                                      # (H, chunk)

        # Layer 3: MXU (OUT, H) @ (H, chunk).
        out = jnp.dot(w3, h2, preferred_element_type=jnp.float32) + b3   # (OUT, chunk)

        if apply_sigmoid:
            # sigmoid(x) = 0.5 * tanh(0.5 * x) + 0.5 : one EUP push per vreg,
            # no f32 divide / exp on the VPU.
            out = 0.5 * jnp.tanh(0.5 * out) + 0.5

        o_ref[:, pl.ds(off, chunk)] = out      # lane-dense store


@functools.partial(jax.jit, static_argnames=("tile_n", "chunk", "apply_sigmoid"))
def _paramnn_run(t, w1, b1, w2, b2, w3, b3, *, tile_n, chunk, apply_sigmoid):
    """Runs the kernel on the raw (1, N) time row; returns the (OUT, N) output."""
    n = t.size
    t_row = t.reshape(1, n).astype(jnp.float32)          # time on the lane axis

    # Partial last block: OOB reads are garbage (lane-wise only, no cross-lane
    # reductions), OOB writes are dropped -> no host-side padding or slicing.
    grid = (pl.cdiv(n, tile_n),)

    full = lambda arr: pl.BlockSpec(arr.shape, lambda i: (0, 0))

    kernel = functools.partial(_paramnn_kernel, chunk=chunk, apply_sigmoid=apply_sigmoid)

    flops_per_t = 2 * HIDDEN + 2 * HIDDEN * HIDDEN + HIDDEN + 2 * OUT * HIDDEN + OUT
    trans_per_t = 2 * HIDDEN + (OUT if apply_sigmoid else 0)
    weight_bytes = 4 * (HIDDEN + HIDDEN + HIDDEN * HIDDEN + HIDDEN + OUT * HIDDEN + OUT)
    cost = pl.CostEstimate(
        flops=flops_per_t * n,
        transcendentals=trans_per_t * n,
        bytes_accessed=(4 + 4 * OUT) * n + weight_bytes,
    )

    return pl.pallas_call(
        kernel,
        out_shape=jax.ShapeDtypeStruct((OUT, n), jnp.float32),
        grid_spec=pltpu.PrefetchScalarGridSpec(
            num_scalar_prefetch=0,
            grid=grid,
            in_specs=[
                pl.BlockSpec((1, tile_n), lambda i: (0, i)),      # time tile (lane-major)
                full(w1), full(b1),
                full(w2), full(b2),
                full(w3), full(b3),
            ],
            out_specs=pl.BlockSpec((OUT, tile_n), lambda i: (0, i)),  # lane-dense
        ),
        compiler_params=pltpu.CompilerParams(
            dimension_semantics=("parallel",),   # grid steps shard across v7x's 2 TCs
        ),
        cost_estimate=cost,
    )(t_row, w1, b1, w2, b2, w3, b3)


def _effective_tiles(n, tile_n, chunk):
    """Pick tile/chunk: >=2 grid steps (v7x megacore), multiples of 128 lanes."""
    assert tile_n % 128 == 0 and tile_n > 0, "tile_n must be a positive multiple of 128"
    assert chunk % 128 == 0 and chunk > 0, "chunk must be a positive multiple of 128"
    tile_eff = max(128, min(tile_n, _round_up(pl.cdiv(n, 2), 128)))
    chunk_eff = min(chunk, tile_eff)
    while tile_eff % chunk_eff:
        chunk_eff -= 128
    return tile_eff, chunk_eff


def paramnn_forward_lane_major(t, w1, b1, w2, b2, w3, b3, *,
                               tile_n=_DEFAULT_TILE_N, chunk=_DEFAULT_CHUNK):
    """Kernel-native layout: t (N,1)/(N,) -> (8, N) pre-sigmoid logits, no extra passes."""
    n = int(t.shape[0])
    tile_eff, chunk_eff = _effective_tiles(n, tile_n, chunk)
    return _paramnn_run(t, w1, b1, w2, b2, w3, b3,
                        tile_n=tile_eff, chunk=chunk_eff, apply_sigmoid=False)


def paramnn_forward(t, w1, b1, w2, b2, w3, b3, *,
                    tile_n=_DEFAULT_TILE_N, chunk=_DEFAULT_CHUNK):
    """Equivalent of ParamNN.forward: t (N,1) or (N,) f32 -> logits (N, 8) f32.

    Uses a single wrapper transpose of the small 8xN result for PyTorch shape
    parity; use paramnn_forward_lane_major to avoid even that pass.
    """
    return paramnn_forward_lane_major(t, w1, b1, w2, b2, w3, b3,
                                      tile_n=tile_n, chunk=chunk).T


def paramnn_get_params(t, w1, b1, w2, b2, w3, b3, *,
                       tile_n=_DEFAULT_TILE_N, chunk=_DEFAULT_CHUNK):
    """Equivalent of ParamNN.get_params with the sigmoid fused in-kernel.

    Returns ONE contiguous (8, N) float32 array whose rows are
    [beta, gamma, delta, rho, eta, kappa, mu, xi].  Row k is a contiguous view;
    callers wanting the torch-style list can index rows (avoids 8 XLA slices).
    """
    n = int(t.shape[0])
    tile_eff, chunk_eff = _effective_tiles(n, tile_n, chunk)
    return _paramnn_run(t, w1, b1, w2, b2, w3, b3,
                        tile_n=tile_eff, chunk=chunk_eff, apply_sigmoid=True)


def init_paramnn_weights(key, hidden=HIDDEN, out=OUT):
    """Xavier-normal init with tanh gain (matches init_xavier), torch-native layout.

    Weights are (out_features, in_features); biases are (out_features, 1) columns,
    so the kernel computes W @ h + b with the batch axis on the lane dimension.
    """
    gain = 5.0 / 3.0  # nn.init.calculate_gain('tanh')

    def xavier_normal(k, fan_in, fan_out):
        std = gain * jnp.sqrt(2.0 / (fan_in + fan_out))
        return std * jax.random.normal(k, (fan_out, fan_in), dtype=jnp.float32)

    k1, k2, k3 = jax.random.split(key, 3)
    w1 = xavier_normal(k1, 1, hidden)
    b1 = jnp.zeros((hidden, 1), jnp.float32)
    w2 = xavier_normal(k2, hidden, hidden)
    b2 = jnp.zeros((hidden, 1), jnp.float32)
    w3 = xavier_normal(k3, hidden, out)
    b3 = jnp.zeros((out, 1), jnp.float32)
    return (w1, b1, w2, b2, w3, b3)


def _reference_forward(t, w1, b1, w2, b2, w3, b3):
    """Plain-JAX reference with identical math (torch-layout weights)."""
    x = t.reshape(-1, 1).astype(jnp.float32)
    h1 = jnp.tanh(x @ w1.T + b1.T)
    h2 = jnp.tanh(h1 @ w2.T + b2.T)
    return h2 @ w3.T + b3.T


# TODO(synk): load_and_preprocess_data (pandas CSV preprocessing) is host-side and
# has no Pallas equivalent; the kernel covers the ParamNN forward / get_params math.

if __name__ == "__main__":
    key = jax.random.PRNGKey(0)
    weights = init_paramnn_weights(key)

    # ~5 months of daily data, like torch.arange(len(data)).view(-1, 1).
    # N is NOT a multiple of the tile -> exercises the partial last block
    # (no host-side padding), and the capped tile gives a 2-step grid so both
    # v7x TensorCores get work.
    N = 300
    t = jnp.arange(N, dtype=jnp.float32).reshape(N, 1)

    ref = _reference_forward(t, *weights)

    # forward: kernel-native lane-major (8, N) and PyTorch-parity (N, 8).
    out_lm = jax.block_until_ready(paramnn_forward_lane_major(t, *weights))
    assert out_lm.shape == (OUT, N)
    assert jnp.allclose(out_lm, ref.T, atol=1e-4, rtol=1e-4), "lane-major forward mismatch"

    out = jax.block_until_ready(paramnn_forward(t, *weights))
    assert out.shape == (N, OUT)
    assert jnp.allclose(out, ref, atol=1e-4, rtol=1e-4), "forward mismatch vs JAX reference"

    # get_params: tanh-form sigmoid fused in-kernel, one contiguous (8, N) array.
    params = jax.block_until_ready(paramnn_get_params(t, *weights))
    ref_sig = jax.nn.sigmoid(ref)
    assert params.shape == (OUT, N)
    assert jnp.allclose(params, ref_sig.T, atol=1e-4, rtol=1e-4), "get_params mismatch"

    # Larger N exercises the multi-chunk inner loop (4096-lane tiles, 512-lane
    # chunks), a 3-step grid, and a partial last block, all without padding.
    N2 = 9000
    t2 = jnp.linspace(0.0, 30.0, N2, dtype=jnp.float32).reshape(N2, 1)
    out2 = jax.block_until_ready(paramnn_forward_lane_major(t2, *weights))
    ref2 = _reference_forward(t2, *weights)
    assert jnp.allclose(out2, ref2.T, atol=1e-4, rtol=1e-4), "large-N forward mismatch"

    print("KERNEL_OK")
</pallas_src>

<mosaic_0001>
module attributes {stable_mosaic.version = 11 : i64} {
  func.func @_paramnn_kernel(%arg0: i32, %arg1: memref<1x256xf32, #tpu.memory_space<vmem>>, %arg2: memref<10x1xf32, #tpu.memory_space<vmem>>, %arg3: memref<10x1xf32, #tpu.memory_space<vmem>>, %arg4: memref<10x10xf32, #tpu.memory_space<vmem>>, %arg5: memref<10x1xf32, #tpu.memory_space<vmem>>, %arg6: memref<8x10xf32, #tpu.memory_space<vmem>>, %arg7: memref<8x1xf32, #tpu.memory_space<vmem>>, %arg8: memref<8x256xf32, #tpu.memory_space<vmem>>) attributes {dimension_semantics = [#tpu.dimension_semantics<parallel>], iteration_bounds = array<i64: 2>, scalar_prefetch = 0 : i64, scratch_operands = 0 : i64, tpu.core_type = #tpu.core_type<tc>, window_params = [{transform_indices = @transform_0, window_bounds = array<i64: 1, 256>}, {pipeline_mode = #tpu.pipeline_mode<synchronous>, transform_indices = @transform_1, window_bounds = array<i64: 10, 1>}, {pipeline_mode = #tpu.pipeline_mode<synchronous>, transform_indices = @transform_2, window_bounds = array<i64: 10, 1>}, {pipeline_mode = #tpu.pipeline_mode<synchronous>, transform_indices = @transform_3, window_bounds = array<i64: 10, 10>}, {pipeline_mode = #tpu.pipeline_mode<synchronous>, transform_indices = @transform_4, window_bounds = array<i64: 10, 1>}, {pipeline_mode = #tpu.pipeline_mode<synchronous>, transform_indices = @transform_5, window_bounds = array<i64: 8, 10>}, {pipeline_mode = #tpu.pipeline_mode<synchronous>, transform_indices = @transform_6, window_bounds = array<i64: 8, 1>}, {transform_indices = @transform_7, window_bounds = array<i64: 8, 256>}]} {
    %c0 = arith.constant 0 : index
    %c0_0 = arith.constant 0 : index
    %0 = vector.load %arg2[%c0, %c0_0] : memref<10x1xf32, #tpu.memory_space<vmem>>, vector<10x1xf32>
    %c0_1 = arith.constant 0 : index
    %c0_2 = arith.constant 0 : index
    %1 = vector.load %arg3[%c0_1, %c0_2] : memref<10x1xf32, #tpu.memory_space<vmem>>, vector<10x1xf32>
    %c0_3 = arith.constant 0 : index
    %c0_4 = arith.constant 0 : index
    %2 = vector.load %arg4[%c0_3, %c0_4] : memref<10x10xf32, #tpu.memory_space<vmem>>, vector<10x10xf32>
    %c0_5 = arith.constant 0 : index
    %c0_6 = arith.constant 0 : index
    %3 = vector.load %arg5[%c0_5, %c0_6] : memref<10x1xf32, #tpu.memory_space<vmem>>, vector<10x1xf32>
    %c0_7 = arith.constant 0 : index
    %c0_8 = arith.constant 0 : index
    %4 = vector.load %arg6[%c0_7, %c0_8] : memref<8x10xf32, #tpu.memory_space<vmem>>, vector<8x10xf32>
    %c0_9 = arith.constant 0 : index
    %c0_10 = arith.constant 0 : index
    %5 = vector.load %arg7[%c0_9, %c0_10] : memref<8x1xf32, #tpu.memory_space<vmem>>, vector<8x1xf32>
    %c0_11 = arith.constant 0 : index
    %c0_12 = arith.constant 0 : index
    %6 = vector.load %arg1[%c0_11, %c0_12] : memref<1x256xf32, #tpu.memory_space<vmem>>, vector<1x256xf32>
    %7 = vector.broadcast %0 : vector<10x1xf32> to vector<10x256xf32>
    %8 = vector.broadcast %6 : vector<1x256xf32> to vector<10x256xf32>
    %9 = arith.mulf %7, %8 : vector<10x256xf32>
    %10 = vector.broadcast %1 : vector<10x1xf32> to vector<10x256xf32>
    %11 = arith.addf %9, %10 : vector<10x256xf32>
    %12 = math.tanh %11 : vector<10x256xf32>
    %cst = arith.constant dense<0.000000e+00> : vector<10x256xf32>
    %13 = tpu.matmul %2, %12, %cst {dimension_numbers = #tpu.dot_dimension_numbers<[1], [0], [0], [1], [0, 0, 1, 1], [], []>} : vector<10x10xf32>, vector<10x256xf32>, vector<10x256xf32> -> vector<10x256xf32>
    %14 = vector.broadcast %3 : vector<10x1xf32> to vector<10x256xf32>
    %15 = arith.addf %13, %14 : vector<10x256xf32>
    %16 = math.tanh %15 : vector<10x256xf32>
    %cst_13 = arith.constant dense<0.000000e+00> : vector<8x256xf32>
    %17 = tpu.matmul %4, %16, %cst_13 {dimension_numbers = #tpu.dot_dimension_numbers<[1], [0], [0], [1], [0, 0, 1, 1], [], []>} : vector<8x10xf32>, vector<10x256xf32>, vector<8x256xf32> -> vector<8x256xf32>
    %18 = vector.broadcast %5 : vector<8x1xf32> to vector<8x256xf32>
    %19 = arith.addf %17, %18 : vector<8x256xf32>
    %c0_14 = arith.constant 0 : index
    %c0_15 = arith.constant 0 : index
    %20 = vector.load %arg8[%c0_14, %c0_15] : memref<8x256xf32, #tpu.memory_space<vmem>>, vector<8x256xf32>
    tpu.vector_store %arg8[%c0_14, %c0_15], %19 {strides = array<i32>} : memref<8x256xf32, #tpu.memory_space<vmem>>, vector<8x256xf32>,
    return
  }
  func.func @transform_0(%arg0: i32) -> (i32, i32) {
    %c0_i32 = arith.constant 0 : i32
    %c0_i32_0 = arith.constant 0 : i32
    return %c0_i32, %arg0 : i32, i32
  }
  func.func @transform_1(%arg0: i32) -> (i32, i32) {
    %c0_i32 = arith.constant 0 : i32
    %c0_i32_0 = arith.constant 0 : i32
    %c0_i32_1 = arith.constant 0 : i32
    return %c0_i32, %c0_i32_0 : i32, i32
  }
  func.func @transform_2(%arg0: i32) -> (i32, i32) {
    %c0_i32 = arith.constant 0 : i32
    %c0_i32_0 = arith.constant 0 : i32
    %c0_i32_1 = arith.constant 0 : i32
    return %c0_i32, %c0_i32_0 : i32, i32
  }
  func.func @transform_3(%arg0: i32) -> (i32, i32) {
    %c0_i32 = arith.constant 0 : i32
    %c0_i32_0 = arith.constant 0 : i32
    %c0_i32_1 = arith.constant 0 : i32
    return %c0_i32, %c0_i32_0 : i32, i32
  }
  func.func @transform_4(%arg0: i32) -> (i32, i32) {
    %c0_i32 = arith.constant 0 : i32
    %c0_i32_0 = arith.constant 0 : i32
    %c0_i32_1 = arith.constant 0 : i32
    return %c0_i32, %c0_i32_0 : i32, i32
  }
  func.func @transform_5(%arg0: i32) -> (i32, i32) {
    %c0_i32 = arith.constant 0 : i32
    %c0_i32_0 = arith.constant 0 : i32
    %c0_i32_1 = arith.constant 0 : i32
    return %c0_i32, %c0_i32_0 : i32, i32
  }
  func.func @transform_6(%arg0: i32) -> (i32, i32) {
    %c0_i32 = arith.constant 0 : i32
    %c0_i32_0 = arith.constant 0 : i32
    %c0_i32_1 = arith.constant 0 : i32
    return %c0_i32, %c0_i32_0 : i32, i32
  }
  func.func @transform_7(%arg0: i32) -> (i32, i32) {
    %c0_i32 = arith.constant 0 : i32
    %c0_i32_0 = arith.constant 0 : i32
    return %c0_i32, %arg0 : i32, i32
  }
}

</mosaic_0001>

<bundles_post_ra>
// kernel: _paramnn_run.1
= control target key start
LH: loop header
LB: loop body
LE: loop exit
PB: predicated region body
PF: predicated region fallthrough
CT: control target
= control target key end

     0   :  { %12 = vsyncpa [#allocation3], 0  ;;  %s982_s0 = inlined_call_operand.vmem [shape: f32[1,300], index: 0, kind: input, shape index: {}]   ;;  %s983_s1 = inlined_call_operand.vmem [shape: f32[10,1], index: 1, kind: input, shape index: {}]   ;;  %s984_s2 = inlined_call_operand.vmem [shape: f32[10,1], index: 2, kind: input, shape index: {}]   ;;  %s985_s3 = inlined_call_operand.vmem [shape: f32[10,10], index: 3, kind: input, shape index: {}]   ;;  %s986_s4 = inlined_call_operand.vmem [shape: f32[10,1], index: 4, kind: input, shape index: {}]   ;;  %s987_s5 = inlined_call_operand.vmem [shape: f32[8,10], index: 5, kind: input, shape index: {}]   ;;  %s988_s6 = inlined_call_operand.vmem [shape: f32[8,1], index: 6, kind: input, shape index: {}]   ;;  %s989_s7 = inlined_call_operand.hbm [shape: f32[8,300], index: 7, kind: output, shape index: {}]  }
   0x1   :  { %14 = vsyncpa [#allocation3 + $0x1], 0  ;;  %s826_s24 = smov 0   ;;  %s828_s25 = smov 0  }
   0x2   :  { %s830_s26 = smov 0   ;;  %s832_s27 = smov 0  }
   0x3 LB: > { %s847_s28 = sadd.s32 4294967295, %s780_s27   ;;  %s624_s29 = sadd.s32 4294967294, %s780_s27   ;;  %s780_s27 = sphi %s832_s27, %s997_s27   ;;  %s776_s26 = sphi %s830_s26, %s996_s26   ;;  %s772_s25 = sphi %s828_s25, %s995_s25   ;;  %s768_s24 = sphi %s826_s24, %s994_s24  }
   0x4   : > { %s851_s30 = sadd.s32 1, %s780_s27   ;;  %s179_s8 = sadd.s32 1, %s776_s26 }
   0x5   : > { %s176_s9 = ssub.s32 %s780_s27, %s851_s30  ;;  %p189_p0 = scmp.ne.s32.totalorder %s776_s26, %s772_s25 }
   0x6   : > { %p177_p1 = scmp.eq.s32.totalorder %s176_s9, 0  ;;  %p190_p2 = scmp.eq.s32.totalorder %s847_s28, 1 }
   0x7   : > { %p195_p3 = scmp.ne.s32.totalorder %s772_s25, %s768_s24  ;;  %p196_p4 = scmp.eq.s32.totalorder %s624_s29, 1 }
   0x8   : > { %s862_s10 = scalar_select %p177_p1, %s776_s26, %s179_s8  }
   0x9   : > { %p864_p5 = por %p190_p2, %p189_p0  ;;  %p868_p6 = por %p196_p4, %p195_p3 }
   0xa   : > { %p627_p7 = scmp.ge.s32.totalorder %s780_s27, 1  ;;  %p248_p8 = scmp.lt.s32.totalorder %s780_s27, 3 }
   0xc   : > { %p249_p9 = pnand %p627_p7, %p248_p8 }
   0xd   : > { %v303_v0 = vld [vmem:[%s984_s2] sm:$0xff] (!%p249_p9)  ;;  %v782_v2 = vmov (!%p249_p9), 0   ;;  %v304_v3 = vld [vmem:[%s984_s2 + $0x8] sm:$0x3] (!%p249_p9)  ;;  %v783_v8 = vmov (!%p249_p9), 0.0   ;;  %s896_s13 = sshll.u32 (!%p249_p9), %s847_s28, 1  ;;  %v323_v9 = vlaneseq (!%p249_p9) }
   0xe   : > { %252 = sbr.rel (%p249_p9) target bundleno = 648 (0x288), region = 48  ;;  %v301_v1 = vld [vmem:[%s983_s1] sm:$0xff] (!%p249_p9)  ;;  %701 = vset.pattern.permute.xlu1 (!%p249_p9), %v782_v2  ;;  %700 = vset.pattern.permute.xlu0 (!%p249_p9), %v782_v2  ;;  %v302_v4 = vld [vmem:[%s983_s1 + $0x8] sm:$0x3] (!%p249_p9)  ;;  %p288_p10 = scmp.lt.s32.totalorder (!%p249_p9), %s896_s13, 2  ;;  %vm372_vm0 = vcmask (!%p249_p9), 1041408  }
   0xf   : > { %339 = vperm.xlu1 (!%p249_p9), %701, %v303_v0   ;;  %314 = vperm.xlu0 (!%p249_p9), %700, %v301_v1   ;;  %v308_v5 = vld [vmem:[%s986_s4 + $0x8] sm:$0x3] (!%p249_p9)  ;;  %v307_v6 = vld [vmem:[%s986_s4] sm:$0xff] (!%p249_p9)  ;;  %v324_v10 = vshrl.u32 (!%p249_p9), %v323_v9, 7  ;;  %vm784_vm1 = vmmov (!%p249_p9), 1   ;;  %vm365_vm3 = vcmask (!%p249_p9), 80896  }
  0x10   : > { %v310_v7 = vld [vmem:[%s988_s6] sm:$0xff] (!%p249_p9)  ;;  %443 = vmatprep.mubr.f32.mxu0 (!%p249_p9), %v783_v8  ;;  %538 = vmatprep.mubr.f32.mxu1 (!%p249_p9), %v783_v8  ;;  %vm903_vm2 = vmpackc.low (!%p249_p9), %vm372_vm0, %vm784_vm1  ;;  %v306_v36 = vld [vmem:[%s985_s3 + $0x8] sm:$0x3] (!%p249_p9)  ;;  %s280_s29 = sand.u32 (!%p249_p9), 1, %s772_s25  }
  0x11   : > { %v325_v11 = vsub.s32 (!%p249_p9), 0, %v324_v10  ;;  %v329_v12 = vsub.s32 (!%p249_p9), 1, %v324_v10  ;;  %v305_v35 = vld [vmem:[%s985_s3] sm:$0xff] (!%p249_p9)  ;;  %s628_s8 = sshll.u32 (!%p249_p9), %s280_s29, 4 }
  0x12   : > { %v309_v53 = vld [vmem:[%s987_s5] sm:$0xff] (!%p249_p9)  ;;  %s282_s9 = scalar_lea.vmem (!%p249_p9), [#allocation2], %s628_s8 }
  0x13   : > { %344 = vperm.xlu1 (!%p249_p9), %701, %v304_v3   ;;  %319 = vperm.xlu0 (!%p249_p9), %700, %v302_v4  }
  0x15   : > { %s289_s14 = scalar_select %p288_p10, %s896_s13, 2 }
  0x16   : > { %s556_s15 = ssub.s32 (%p864_p5), 3, %s896_s13 }
  0x17   : > { %362 = vperm.xlu1 %701, %v308_v5   ;;  %357 = vperm.xlu0 %700, %v307_v6   ;;  %s290_s17 = scalar_lea.vmem %s982_s0, %s289_s14  ;;  %s928_s14 = scalar_lea.sflag [#allocation3], %s280_s29 }
  0x18   : > { %v311_v13 = vld [vmem:[%s290_s17] sm:$0x3]  ;;  %p557_p11 = scmp.lt.s32.totalorder (%p864_p5), %s556_s15, 2 }
  0x19   : > { %v326_v14 = vrot.slane %v311_v13, %v325_v11  ;;  %v330_v15 = vrot.slane %v311_v13, %v329_v12 }
  0x1b   : > { %462 = vperm.xlu0 %700, %v310_v7  }
  0x8e   : > { %v340_v16 = vpop.permute.xlu1 %339  ;;  %v315_v17 = vpop.permute.xlu0 %314 }
  0x8f   : > { %v333_v18 = vmul.f32 %v326_v14, %v315_v17  ;;  %v334_v19 = vmul.f32 %v330_v15, %v315_v17 }
  0x91   : > { %v347_v20 = vadd.f32 %v340_v16, %v333_v18  ;;  %v348_v21 = vadd.f32 %v340_v16, %v334_v19 }
  0x92   : > { %v320_v22 = vpop.permute.xlu0 %319  ;;  %v345_v25 = vpop.permute.xlu1 %344 }
  0x93   : > { %v335_v23 = vmul.f32 %v326_v14, %v320_v22  ;;  %v336_v24 = vmul.f32 %v330_v15, %v320_v22  ;;  %702 = vtanh.f32 %v347_v20 }
  0x94   : > { %704 = vtanh.f32 %v348_v21 }
  0x95   : > { %v349_v26 = vadd.f32 %v345_v25, %v335_v23  ;;  %v350_v27 = vadd.f32 %v345_v25, %v336_v24 }
  0x96   : > { %v358_v37 = vpop.permute.xlu0 %357  ;;  %v363_v42 = vpop.permute.xlu1 %362 }
  0x97   : > { %706 = vtanh.f32 %v349_v26 }
  0x98   : > { %708 = vtanh.f32 %v350_v27 }
  0x9a   : > { %v463_v54 = vpop.permute.xlu0 %462 }
  0x9d   : > { %v703_v28 = vpop.eup %702 }
  0x9e   : > { %v705_v29 = vpop.eup %704 }
  0xa1   : > { %v707_v30 = vpop.eup %706 }
  0xa2   : > { %v709_v31 = vpop.eup %708  ;;  %v650_v33 = vpack.c.bf16 %v707_v30, %v703_v28 }
  0xa3   : > { %v647_v34 = vpack.c.bf16 %v709_v31, %v705_v29 }
  0xa5   : > { %649 = vmatprep.subr.msk.bf16.mxu0 %vm903_vm2, %v647_v34 }
  0xa6   : > { %652 = vmatpush1.bf16.msk.msra.mxu0 %vm903_vm2, %v650_v33 }
  0xa9   : > { %632 = vmatmul.mubr.msk.f32.vlgmr.msra.gmra.mrb[0].mxu0 %vm365_vm3, %v305_v35 }
  0xaa   : > { %449 = vmatprep.mubr.f32.mxu0 %v783_v8 }
  0xad   : > { %633 = vmatmul.mubr.msk.f32.gmra.mrb[2].mxu0 %vm365_vm3, %v306_v36 }
 0x17c   : > { %v445_v38 = vpop.f32.mrb[0].mxu0 }
 0x17d   : > { %v446_v39 = vadd.f32 %v445_v38, %v358_v37  ;;  %v447_v40 = vpop.f32.mrb[1].mxu0 }
 0x17e   : > { %v448_v41 = vadd.f32 %v447_v40, %v358_v37 }
 0x17f   : > { %710 = vtanh.f32 %v446_v39 }
 0x180   : > { %v451_v43 = vpop.f32.mrb[2].mxu0  ;;  %712 = vtanh.f32 %v448_v41 }
 0x181   : > { %v452_v44 = vadd.f32 %v451_v43, %v363_v42  ;;  %v453_v45 = vpop.f32.mrb[3].mxu0 }
 0x182   : > { %v454_v46 = vadd.f32 %v453_v45, %v363_v42 }
 0x183   : > { %714 = vtanh.f32 %v452_v44 }
 0x184   : > { %716 = vtanh.f32 %v454_v46 }
 0x189   : > { %v711_v47 = vpop.eup %710 }
 0x18a   : > { %v713_v48 = vpop.eup %712 }
 0x18d   : > { %v715_v49 = vpop.eup %714 }
 0x18e   : > { %v717_v50 = vpop.eup %716  ;;  %v656_v51 = vpack.c.bf16 %v715_v49, %v711_v47 }
 0x18f   : > { %v653_v52 = vpack.c.bf16 %v717_v50, %v713_v48 }
 0x191   : > { %655 = vmatprep.subr.msk.bf16.mxu1 %vm903_vm2, %v653_v52 }
 0x192   : > { %658 = vmatpush1.bf16.msk.msra.mxu1 %vm903_vm2, %v656_v51 }
 0x195   : > { %636 = vmatmul.mubr.msk.f32.vlgmr.msra.gmra.mrb[0].mxu1 %vm365_vm3, %v309_v53 }
 0x266   : > { %554 = sbr.rel (!%p864_p5) target bundleno = 648 (0x288), region = 52 }
 0x268   : > { %v540_v55 = vpop.f32.mrb[0].mxu1 }
 0x269   : > { %v541_v56 = vadd.f32 %v540_v55, %v463_v54  ;;  %v542_v57 = vpop.f32.mrb[1].mxu1 }
 0x26a   : > { %v543_v58 = vadd.f32 %v542_v57, %v463_v54 }
 0x26b   : > { %545 = vst [vmem:[%s282_s9] sm:$0xff] %v541_v56 }
 0x26c   : > { %546 = vst [vmem:[%s282_s9 + $0x8] sm:$0xff] %v543_v58 }
 0x26d   : > { %s999_s15 = smov (!%p557_p11, %s556_s15), 2 }
 0x26e   : > { %s933_s16 = sshll.u32 %s999_s15, 7 }
 0x26f   : > { %s561_s17 = ssub.s32 256, %s933_s16 }
 0x270   : > { %562 = vsyncadd %s928_s14, %s561_s17  ;;  %p640_p12 = scmp.ne.s32.totalorder %s933_s16, 0  ;;  %s646_s18 = sshll.u32 %s847_s28, 8 }
 0x271   : > { %s942_s11 = scalar_lea.hbm %s989_s7, %s646_s18  ;;  %s568_s21 = sshll.u32 %s282_s9, 4  ;;  %s569_s21 = int_to_ptr.vmem [resolvable:$true] %s568_s21 }
 0x272   : > { %s718_s13 = scalar_lea.vmem %s569_s21, %s933_s16  ;;  %s785_s22 = smov [#allocation2]  }
 0x273   : > { %p719_p13 = scmp.ne.s32.totalorder %s569_s21, %s718_s13  ;;  %s722_s23 = sshll.u32 %s785_s22, 4  ;;  %s723_s23 = int_to_ptr.vmem [resolvable:$false] %s722_s23 }
 0x274   : > { %s724_s29 = scalar_lea.vmem %s723_s23, 512  ;;  %p725_p2 = scmp.lt.s32.totalorder %s569_s21, %s723_s23 }
 0x275   : > { %p720_p0 = pnand %p719_p13, %p640_p12  ;;  %p726_p3 = scmp.lt.s32.totalorder %s724_s29, %s718_s13 }
 0x277   : > { %p721_p1 = pneg %p720_p0  ;;  %p727_p4 = por %p726_p3, %p725_p2 }
 0x279   : > { %p728_p5 = pnand %p727_p4, %p721_p1 }
 0x27b   : > { %731 = shalt.err (!%p728_p5)
}
 0x27c   : > { %s732_s28 = scalar_lea.hbm %s942_s11, %s933_s16  ;;  %s736_s15 = scalar_lea.hbm %s989_s7, 384 }
 0x27d   : > { %p733_p7 = scmp.ne.s32.totalorder %s942_s11, %s732_s28  ;;  %p737_p10 = scmp.lt.u32.totalorder %s942_s11, %s989_s7 }
 0x27e   : > { %p738_p11 = scmp.lt.u32.totalorder %s736_s15, %s732_s28  ;;  %p740_p0 = scmp.lt.u32.totalorder %s732_s28, %s942_s11 }
 0x27f   : > { %p734_p8 = pnand %p733_p7, %p640_p12 }
 0x280   : > { %p739_p13 = por %p738_p11, %p737_p10 }
 0x281   : > { %p735_p9 = pneg %p734_p8 }
 0x282   : > { %p741_p1 = por %p740_p0, %p739_p13 }
 0x284   : > { %p742_p2 = pnand %p741_p1, %p735_p9 }
 0x286   : > { %745 = shalt.err (!%p742_p2)
}
 0x287   : > { %571 = dma.vmem_to_hbm [thread:$0]  (%p640_p12), %s569_s21, %s933_s16, %s942_s11, %s928_s14  }
 0x288 PF: > { %p664_p3 = scmp.ge.s32.totalorder %s780_s27, 2  ;;  %s580_s19 = sand.u32 1, %s768_s24  }
 0x289   : > { %s581_s20 = scalar_lea.sflag [#allocation3], %s580_s19 }
 0x28a   : > { %p661_p4 = pnand %p664_p3, %p868_p6 }
 0x28c   : > { %763 = dma.done.wait (!%p661_p4), %s581_s20, 256  }
 0x28d   : > { %765 = vsyncadd (!%p661_p4), %s581_s20, 4294967040  ;;  %p17_p5 = scmp.ge.s32.totalorder %s851_s30, 4   ;;  %s994_s24 = smov %s772_s25 }
 0x28e   : > { %s995_s25 = smov %s776_s26  ;;  %s996_s26 = smov %s862_s10 }
 0x28f   : > { %s997_s27 = smov %s851_s30  ;;  %19 = sbr.rel (!%p17_p5) target bundleno = 3 (0x3), region = 83 }
 0x296   :  { %586 = vsyncpa [#allocation3], 1 }
 0x297   :  { %588 = vsyncpa [#allocation3 + $0x1], 1 }

</bundles_post_ra>
